<compile_context>
chip_gen: v7x
topology: tpu7x:2x2x1
jax: 0.10.0
libtpu: 0.0.40
codegen_flags: <defaults>
</compile_context>

<pallas_src>
import functools

import jax
import jax.numpy as jnp
from jax.experimental import pallas as pl
from jax.experimental.pallas import tpu as pltpu


_TARGET_BLOCK_ELEMS = 256 * 1024   # ~1 MiB of f32 logits per pipelined block


def _pce_kernel(logits_ref, gt_ref, mask_ref, full_ref, out_ref, *,
                hw, needs_col_mask):
    """One grid step: softmax over C for a (1, C, T) pixel tile plus its three
    partial reductions, written to a private (1, 1, 3) output block."""
    _, c, tile = logits_ref.shape

    x = logits_ref[...].astype(jnp.float32)          # (1, C, T)
    msk = mask_ref[...].astype(jnp.float32)          # (1, 1, T)

    if needs_col_mask:
        # Only the last tile along the pixel axis can run past H*W; mask it so
        # any out-of-bounds garbage (possibly NaN) cannot contribute.
        t_idx = pl.program_id(1)
        col = jax.lax.broadcasted_iota(jnp.int32, (1, 1, tile), 2) + t_idx * tile
        valid = col < hw                              # (1, 1, T)
        validf = valid.astype(jnp.float32)
        x = jnp.where(valid, x, 0.0)
        msk = jnp.where(valid, msk, 0.0)
    else:
        validf = None

    # softmax over the class (sublane) axis
    m = jnp.max(x, axis=1, keepdims=True)             # (1, 1, T)
    e = jnp.exp(x - m)                                 # (1, C, T)
    inv = 1.0 / jnp.sum(e, axis=1, keepdims=True)      # one divide per pixel
    p = e * inv                                        # (1, C, T)

    cls = jax.lax.broadcasted_iota(jnp.int32, (1, c, tile), 1)

    # ---- partial (masked) loss: gather p at ground_truth first, then log ----
    gt = gt_ref[...]                                   # (1, 1, T) int32
    p_gt = jnp.sum(jnp.where(cls == gt, p, 0.0), axis=1, keepdims=True)
    focal = -jnp.log(p_gt + 1e-7)                      # (1, 1, T)
    m_part = jnp.sum(focal * msk, keepdims=True)       # (1, 1, 1)
    w_part = jnp.sum(msk, keepdims=True)               # (1, 1, 1)

    # ---- full CrossEntropyLoss applied to the already-softmaxed probs ----
    full = full_ref[...]                               # (1, 1, T) int32
    full_c = jnp.where(full == 255, 0, full)           # clamp (ignore is then moot)
    p_full = jnp.sum(jnp.where(cls == full_c, p, 0.0), axis=1, keepdims=True)
    lse = jnp.log(jnp.sum(jnp.exp(p), axis=1, keepdims=True))  # p in [0,1]: no max shift
    ce = lse - p_full                                  # (1, 1, T)
    if needs_col_mask:
        ce = ce * validf
    f_part = jnp.sum(ce, keepdims=True)                # (1, 1, 1)

    lane = jax.lax.broadcasted_iota(jnp.int32, (1, 1, 3), 2)
    out_ref[...] = jnp.where(lane == 0, m_part,
                             jnp.where(lane == 1, w_part, f_part))


def partial_cross_entropy_loss(predictions, ground_truth, mask, full_mask,
                               tile_hw=None):
    """JAX/Pallas equivalent of PartialCrossEntropyLoss.forward (returns a scalar)."""
    n, c, h, w = predictions.shape
    if ground_truth.ndim == 4:
        ground_truth = ground_truth[:, 0]
    if mask.ndim == 4:
        mask = mask[:, 0]
    if full_mask.ndim == 4:
        full_mask = full_mask[:, 0]

    hw = h * w
    total_pixels = n * hw

    # Lane-dense layout: pixels on lanes, classes on sublanes; plain reshapes only.
    logits = predictions.reshape(n, c, hw)                   # keep HBM dtype
    gt = ground_truth.reshape(n, 1, hw).astype(jnp.int32)
    msk = mask.reshape(n, 1, hw).astype(jnp.float32)
    fm = full_mask.reshape(n, 1, hw).astype(jnp.int32)

    if tile_hw is None:
        tgt = max(128, ((_TARGET_BLOCK_ELEMS // max(c, 1)) // 128) * 128)
        tile_hw = hw if hw <= tgt else tgt
    tile_hw = min(tile_hw, hw)
    num_t = pl.cdiv(hw, tile_hw)
    needs_col_mask = (hw % tile_hw) != 0

    grid = (n, num_t)
    grid_spec = pltpu.PrefetchScalarGridSpec(
        num_scalar_prefetch=0,
        grid=grid,
        in_specs=[
            pl.BlockSpec((1, c, tile_hw), lambda i, t: (i, 0, t)),
            pl.BlockSpec((1, 1, tile_hw), lambda i, t: (i, 0, t)),
            pl.BlockSpec((1, 1, tile_hw), lambda i, t: (i, 0, t)),
            pl.BlockSpec((1, 1, tile_hw), lambda i, t: (i, 0, t)),
        ],
        out_specs=pl.BlockSpec((1, 1, 3), lambda i, t: (i * num_t + t, 0, 0)),
    )

    parts = pl.pallas_call(
        functools.partial(_pce_kernel, hw=hw, needs_col_mask=needs_col_mask),
        out_shape=jax.ShapeDtypeStruct((n * num_t, 1, 3), jnp.float32),
        grid_spec=grid_spec,
        compiler_params=pltpu.CompilerParams(
            dimension_semantics=("parallel", "parallel"),
            vmem_limit_bytes=32 * 1024 * 1024,
        ),
    )(logits, gt, msk, fm)

    # Final (tiny) combine in plain JAX: sum the per-block partials and apply the
    # two normalizations.
    sums = jnp.sum(parts[:, 0, :], axis=0)                   # (3,)
    loss = sums[0] / (sums[1] + 1e-7)
    full_loss = sums[2] / float(total_pixels)
    return loss + 0.5 * full_loss


def _reference(predictions, ground_truth, mask, full_mask):
    """Pure-JAX reference mirroring the PyTorch forward (for a correctness check)."""
    p = jax.nn.softmax(predictions.astype(jnp.float32), axis=1)
    if ground_truth.ndim == 4:
        ground_truth = ground_truth[:, 0]
    if mask.ndim == 4:
        mask = mask[:, 0]
    if full_mask.ndim == 4:
        full_mask = full_mask[:, 0]
    fl = -jnp.log(p + 1e-7)
    gathered = jnp.take_along_axis(fl, ground_truth[:, None].astype(jnp.int32),
                                   axis=1)[:, 0]
    loss = jnp.sum(gathered * mask) / (jnp.sum(mask) + 1e-7)
    fm = jnp.where(full_mask == 255, 0, full_mask).astype(jnp.int32)
    logp = jax.nn.log_softmax(p, axis=1)
    nll = -jnp.take_along_axis(logp, fm[:, None], axis=1)[:, 0]
    full_loss = jnp.mean(nll)
    return loss + 0.5 * full_loss


if __name__ == "__main__":
    key = jax.random.PRNGKey(0)
    k1, k2, k3, k4, k5 = jax.random.split(key, 5)
    N, C, H, W = 2, 4, 16, 16

    predictions = jax.random.normal(k1, (N, C, H, W), dtype=jnp.float32)
    ground_truth = jax.random.randint(k2, (N, 1, H, W), 0, C, dtype=jnp.int32)
    mask = (jax.random.uniform(k3, (N, 1, H, W)) > 0.5).astype(jnp.float32)
    full_mask = jax.random.randint(k4, (N, H, W), 0, C, dtype=jnp.int32)
    ignore = jax.random.uniform(k5, (N, H, W)) < 0.2
    full_mask = jnp.where(ignore, 255, full_mask)

    result = jax.block_until_ready(
        partial_cross_entropy_loss(predictions, ground_truth, mask, full_mask))
    ref = jax.block_until_ready(
        _reference(predictions, ground_truth, mask, full_mask))
    assert abs(float(result) - float(ref)) < 1e-4, (float(result), float(ref))

    # Second check: H*W not a multiple of the tile -> exercises the in-kernel
    # tail mask (no host-side padding is used).
    H2, W2 = 16, 20
    kk = jax.random.split(jax.random.PRNGKey(1), 5)
    p2 = jax.random.normal(kk[0], (N, C, H2, W2), dtype=jnp.float32)
    g2 = jax.random.randint(kk[1], (N, 1, H2, W2), 0, C, dtype=jnp.int32)
    m2 = (jax.random.uniform(kk[2], (N, 1, H2, W2)) > 0.5).astype(jnp.float32)
    f2 = jax.random.randint(kk[3], (N, H2, W2), 0, C, dtype=jnp.int32)
    f2 = jnp.where(jax.random.uniform(kk[4], (N, H2, W2)) < 0.2, 255, f2)

    r2 = jax.block_until_ready(
        partial_cross_entropy_loss(p2, g2, m2, f2, tile_hw=128))
    ref2 = jax.block_until_ready(_reference(p2, g2, m2, f2))
    assert abs(float(r2) - float(ref2)) < 1e-4, (float(r2), float(ref2))

    print("KERNEL_OK")
</pallas_src>

<mosaic_0001>
module attributes {stable_mosaic.version = 11 : i64} {
  func.func @_pce_kernel(%arg0: i32, %arg1: i32, %arg2: memref<1x4x256xf32, #tpu.memory_space<vmem>>, %arg3: memref<1x1x256xi32, #tpu.memory_space<vmem>>, %arg4: memref<1x1x256xf32, #tpu.memory_space<vmem>>, %arg5: memref<1x1x256xi32, #tpu.memory_space<vmem>>, %arg6: memref<1x1x3xf32, #tpu.memory_space<vmem>>) attributes {dimension_semantics = [#tpu.dimension_semantics<parallel>, #tpu.dimension_semantics<parallel>], iteration_bounds = array<i64: 2, 1>, scalar_prefetch = 0 : i64, scratch_operands = 0 : i64, tpu.core_type = #tpu.core_type<tc>, window_params = [{transform_indices = @transform_0, window_bounds = array<i64: 1, 4, 256>}, {transform_indices = @transform_1, window_bounds = array<i64: 1, 1, 256>}, {transform_indices = @transform_2, window_bounds = array<i64: 1, 1, 256>}, {transform_indices = @transform_3, window_bounds = array<i64: 1, 1, 256>}, {transform_indices = @transform_4, window_bounds = array<i64: 1, 1, 3>}]} {
    %c0 = arith.constant 0 : index
    %c0_0 = arith.constant 0 : index
    %c0_1 = arith.constant 0 : index
    %0 = vector.load %arg2[%c0, %c0_0, %c0_1] : memref<1x4x256xf32, #tpu.memory_space<vmem>>, vector<1x4x256xf32>
    %c0_2 = arith.constant 0 : index
    %c0_3 = arith.constant 0 : index
    %c0_4 = arith.constant 0 : index
    %1 = vector.load %arg4[%c0_2, %c0_3, %c0_4] : memref<1x1x256xf32, #tpu.memory_space<vmem>>, vector<1x1x256xf32>
    %cst = arith.constant dense<0xFF800000> : vector<1x256xf32>
    %2 = vector.multi_reduction <maximumf>, %0, %cst [1] : vector<1x4x256xf32> to vector<1x256xf32>
    %3 = vector.shape_cast %2 : vector<1x256xf32> to vector<1x1x256xf32>
    %4 = vector.broadcast %3 : vector<1x1x256xf32> to vector<1x4x256xf32>
    %5 = arith.subf %0, %4 : vector<1x4x256xf32>
    %6 = math.exp %5 : vector<1x4x256xf32>
    %cst_5 = arith.constant dense<0.000000e+00> : vector<1x256xf32>
    %7 = vector.multi_reduction <add>, %6, %cst_5 [1] : vector<1x4x256xf32> to vector<1x256xf32>
    %8 = vector.shape_cast %7 : vector<1x256xf32> to vector<1x1x256xf32>
    %cst_6 = arith.constant 1.000000e+00 : f32
    %9 = vector.broadcast %cst_6 : f32 to vector<1x1x256xf32>
    %10 = arith.divf %9, %8 : vector<1x1x256xf32>
    %11 = vector.broadcast %10 : vector<1x1x256xf32> to vector<1x4x256xf32>
    %12 = arith.mulf %6, %11 : vector<1x4x256xf32>
    %13 = tpu.iota {dimensions = array<i32: 1>} : vector<1x4x256xi32>
    %c0_7 = arith.constant 0 : index
    %c0_8 = arith.constant 0 : index
    %c0_9 = arith.constant 0 : index
    %14 = vector.load %arg3[%c0_7, %c0_8, %c0_9] : memref<1x1x256xi32, #tpu.memory_space<vmem>>, vector<1x1x256xi32>
    %15 = vector.broadcast %14 : vector<1x1x256xi32> to vector<1x4x256xi32>
    %16 = arith.cmpi eq, %13, %15 : vector<1x4x256xi32>
    %cst_10 = arith.constant 0.000000e+00 : f32
    %17 = vector.broadcast %cst_10 : f32 to vector<1x4x256xf32>
    %18 = arith.select %16, %12, %17 : vector<1x4x256xi1>, vector<1x4x256xf32>
    %cst_11 = arith.constant dense<0.000000e+00> : vector<1x256xf32>
    %19 = vector.multi_reduction <add>, %18, %cst_11 [1] : vector<1x4x256xf32> to vector<1x256xf32>
    %20 = vector.shape_cast %19 : vector<1x256xf32> to vector<1x1x256xf32>
    %cst_12 = arith.constant 1.000000e-07 : f32
    %21 = vector.broadcast %cst_12 : f32 to vector<1x1x256xf32>
    %22 = arith.addf %20, %21 : vector<1x1x256xf32>
    %23 = math.log %22 : vector<1x1x256xf32>
    %cst_13 = arith.constant 0.000000e+00 : f32
    %24 = vector.broadcast %cst_13 : f32 to vector<1x1x256xf32>
    %25 = arith.subf %24, %23 : vector<1x1x256xf32>
    %26 = arith.mulf %25, %1 : vector<1x1x256xf32>
    %27 = vector.shape_cast %26 : vector<1x1x256xf32> to vector<1x1x1x256xf32>
    %cst_14 = arith.constant dense<0.000000e+00> : vector<1xf32>
    %28 = vector.multi_reduction <add>, %27, %cst_14 [1, 2, 3] : vector<1x1x1x256xf32> to vector<1xf32>
    %29 = vector.shape_cast %28 : vector<1xf32> to vector<1x1x1x1xf32>
    %30 = vector.extract %29[0, 0, 0, 0] : f32 from vector<1x1x1x1xf32>
    %31 = vector.broadcast %30 : f32 to vector<1x1x1xf32>
    %32 = vector.shape_cast %1 : vector<1x1x256xf32> to vector<1x1x1x256xf32>
    %cst_15 = arith.constant dense<0.000000e+00> : vector<1xf32>
    %33 = vector.multi_reduction <add>, %32, %cst_15 [1, 2, 3] : vector<1x1x1x256xf32> to vector<1xf32>
    %34 = vector.shape_cast %33 : vector<1xf32> to vector<1x1x1x1xf32>
    %35 = vector.extract %34[0, 0, 0, 0] : f32 from vector<1x1x1x1xf32>
    %36 = vector.broadcast %35 : f32 to vector<1x1x1xf32>
    %c0_16 = arith.constant 0 : index
    %c0_17 = arith.constant 0 : index
    %c0_18 = arith.constant 0 : index
    %37 = vector.load %arg5[%c0_16, %c0_17, %c0_18] : memref<1x1x256xi32, #tpu.memory_space<vmem>>, vector<1x1x256xi32>
    %c255_i32 = arith.constant 255 : i32
    %38 = vector.broadcast %c255_i32 : i32 to vector<1x1x256xi32>
    %39 = arith.cmpi eq, %37, %38 : vector<1x1x256xi32>
    %c0_i32 = arith.constant 0 : i32
    %40 = vector.broadcast %c0_i32 : i32 to vector<1x1x256xi32>
    %41 = arith.select %39, %40, %37 : vector<1x1x256xi1>, vector<1x1x256xi32>
    %42 = vector.broadcast %41 : vector<1x1x256xi32> to vector<1x4x256xi32>
    %43 = arith.cmpi eq, %13, %42 : vector<1x4x256xi32>
    %cst_19 = arith.constant 0.000000e+00 : f32
    %44 = vector.broadcast %cst_19 : f32 to vector<1x4x256xf32>
    %45 = arith.select %43, %12, %44 : vector<1x4x256xi1>, vector<1x4x256xf32>
    %cst_20 = arith.constant dense<0.000000e+00> : vector<1x256xf32>
    %46 = vector.multi_reduction <add>, %45, %cst_20 [1] : vector<1x4x256xf32> to vector<1x256xf32>
    %47 = vector.shape_cast %46 : vector<1x256xf32> to vector<1x1x256xf32>
    %48 = math.exp %12 : vector<1x4x256xf32>
    %cst_21 = arith.constant dense<0.000000e+00> : vector<1x256xf32>
    %49 = vector.multi_reduction <add>, %48, %cst_21 [1] : vector<1x4x256xf32> to vector<1x256xf32>
    %50 = vector.shape_cast %49 : vector<1x256xf32> to vector<1x1x256xf32>
    %51 = math.log %50 : vector<1x1x256xf32>
    %52 = arith.subf %51, %47 : vector<1x1x256xf32>
    %53 = vector.shape_cast %52 : vector<1x1x256xf32> to vector<1x1x1x256xf32>
    %cst_22 = arith.constant dense<0.000000e+00> : vector<1xf32>
    %54 = vector.multi_reduction <add>, %53, %cst_22 [1, 2, 3] : vector<1x1x1x256xf32> to vector<1xf32>
    %55 = vector.shape_cast %54 : vector<1xf32> to vector<1x1x1x1xf32>
    %56 = vector.extract %55[0, 0, 0, 0] : f32 from vector<1x1x1x1xf32>
    %57 = vector.broadcast %56 : f32 to vector<1x1x1xf32>
    %58 = tpu.iota {dimensions = array<i32: 2>} : vector<1x1x3xi32>
    %c0_i32_23 = arith.constant 0 : i32
    %59 = vector.broadcast %c0_i32_23 : i32 to vector<1x1x3xi32>
    %60 = arith.cmpi eq, %58, %59 : vector<1x1x3xi32>
    %c1_i32 = arith.constant 1 : i32
    %61 = vector.broadcast %c1_i32 : i32 to vector<1x1x3xi32>
    %62 = arith.cmpi eq, %58, %61 : vector<1x1x3xi32>
    %63 = vector.shape_cast %36 : vector<1x1x1xf32> to vector<1x1x1xf32>
    %64 = vector.broadcast %63 : vector<1x1x1xf32> to vector<1x1x3xf32>
    %65 = vector.shape_cast %57 : vector<1x1x1xf32> to vector<1x1x1xf32>
    %66 = vector.broadcast %65 : vector<1x1x1xf32> to vector<1x1x3xf32>
    %67 = arith.select %62, %64, %66 : vector<1x1x3xi1>, vector<1x1x3xf32>
    %68 = vector.shape_cast %31 : vector<1x1x1xf32> to vector<1x1x1xf32>
    %69 = vector.broadcast %68 : vector<1x1x1xf32> to vector<1x1x3xf32>
    %70 = arith.select %60, %69, %67 : vector<1x1x3xi1>, vector<1x1x3xf32>
    %c0_24 = arith.constant 0 : index
    %c0_25 = arith.constant 0 : index
    %c0_26 = arith.constant 0 : index
    %71 = vector.load %arg6[%c0_24, %c0_25, %c0_26] : memref<1x1x3xf32, #tpu.memory_space<vmem>>, vector<1x1x3xf32>
    tpu.vector_store %arg6[%c0_24, %c0_25, %c0_26], %70 {strides = array<i32>} : memref<1x1x3xf32, #tpu.memory_space<vmem>>, vector<1x1x3xf32>,
    return
  }
  func.func @transform_0(%arg0: i32, %arg1: i32) -> (i32, i32, i32) {
    %c0_i32 = arith.constant 0 : i32
    %c0_i32_0 = arith.constant 0 : i32
    return %arg0, %c0_i32, %arg1 : i32, i32, i32
  }
  func.func @transform_1(%arg0: i32, %arg1: i32) -> (i32, i32, i32) {
    %c0_i32 = arith.constant 0 : i32
    %c0_i32_0 = arith.constant 0 : i32
    return %arg0, %c0_i32, %arg1 : i32, i32, i32
  }
  func.func @transform_2(%arg0: i32, %arg1: i32) -> (i32, i32, i32) {
    %c0_i32 = arith.constant 0 : i32
    %c0_i32_0 = arith.constant 0 : i32
    return %arg0, %c0_i32, %arg1 : i32, i32, i32
  }
  func.func @transform_3(%arg0: i32, %arg1: i32) -> (i32, i32, i32) {
    %c0_i32 = arith.constant 0 : i32
    %c0_i32_0 = arith.constant 0 : i32
    return %arg0, %c0_i32, %arg1 : i32, i32, i32
  }
  func.func @transform_4(%arg0: i32, %arg1: i32) -> (i32, i32, i32) {
    %c1_i32 = arith.constant 1 : i32
    %0 = arith.muli %arg0, %c1_i32 : i32
    %1 = arith.addi %0, %arg1 : i32
    %c0_i32 = arith.constant 0 : i32
    %c0_i32_0 = arith.constant 0 : i32
    %c0_i32_1 = arith.constant 0 : i32
    return %1, %c0_i32, %c0_i32_0 : i32, i32, i32
  }
}

</mosaic_0001>

<bundles_post_ra>
// kernel: tpu_custom_call.1
= control target key start
LH: loop header
LB: loop body
LE: loop exit
PB: predicated region body
PF: predicated region fallthrough
CT: control target
= control target key end

     0   :  { %9 = vsyncpa [#allocation3], 0  ;;  %s1246_s0 = inlined_call_operand.hbm [shape: f32[2,4,256], index: 0, kind: input, shape index: {}]   ;;  %s1247_s1 = inlined_call_operand.hbm [shape: s32[2,1,256], index: 1, kind: input, shape index: {}]   ;;  %s1248_s2 = inlined_call_operand.vmem [shape: f32[2,1,256], index: 2, kind: input, shape index: {}]   ;;  %s1249_s3 = inlined_call_operand.vmem [shape: s32[2,1,256], index: 3, kind: input, shape index: {}]   ;;  %s1250_s4 = inlined_call_operand.hbm [shape: f32[2,1,3], index: 4, kind: output, shape index: {}]  }
   0x1   :  { %11 = vsyncpa [#allocation3 + $0x1], 0 }
   0x2   :  { %12 = vsyncpa [#allocation6], 0 }
   0x3   :  { %14 = vsyncpa [#allocation6 + $0x1], 0 }
   0x4   :  { %15 = vsyncpa [#allocation4], 0 }
   0x5   :  { %17 = vsyncpa [#allocation4 + $0x1], 0  ;;  %s984_s15 = smov 0   ;;  %s986_s16 = smov 0  }
   0x6   :  { %s988_s17 = smov 0   ;;  %s990_s18 = smov 0  }
   0x7   :  { %s992_s19 = smov 0   ;;  %s994_s20 = smov 0  }
   0x8 LB: > { %s698_s21 = sadd.s32 4294967295, %s954_s20   ;;  %s699_s22 = sadd.s32 4294967294, %s954_s20   ;;  %s954_s20 = sphi %s994_s20, %s23_s20   ;;  %s950_s19 = sphi %s992_s19, %s1270_s19   ;;  %s946_s18 = sphi %s990_s18, %s1269_s18   ;;  %s942_s17 = sphi %s988_s17, %s1268_s17   ;;  %s938_s16 = sphi %s986_s16, %s1267_s16   ;;  %s934_s15 = sphi %s984_s15, %s1266_s15  }
   0x9   : > { %s35_s23 = sadd.s32 1, %s950_s19  ;;  %s44_s24 = sadd.s32 1, %s942_s17 }
   0xa   : > { %p37_p0 = scmp.ge.s32.totalorder %s35_s23, 2  ;;  %p51_p1 = scmp.ne.s32.totalorder %s942_s17, %s938_s16 }
   0xb   : > { %p52_p2 = scmp.eq.s32.totalorder %s954_s20, 0  ;;  %p57_p3 = scmp.ne.s32.totalorder %s938_s16, %s934_s15 }
   0xc   : > { %s1272_s23 = smov (%p37_p0, %s35_s23), 0  ;;  %p58_p5 = scmp.eq.s32.totalorder %s698_s21, 0 }
   0xd   : > { %p1025_p4 = por %p52_p2, %p51_p1  ;;  %s39_s26 = ssub.s32 %s950_s19, %s1272_s23 }
   0xe   : > { %p167_p6 = scmp.eq.s32.totalorder %s698_s21, 1  ;;  %p42_p7 = scmp.eq.s32.totalorder %s39_s26, 0 }
   0xf   : > { %p1031_p8 = por %p58_p5, %p57_p3  ;;  %p173_p10 = scmp.eq.s32.totalorder %s699_s22, 1 }
  0x10   : > { %p1035_p9 = por %p167_p6, %p51_p1  ;;  %p741_p13 = scmp.lt.s32.totalorder %s954_s20, 2 }
  0x11   : > { %s1254_s27 = scalar_select %p1031_p8, 1, 0 }
  0x12   : > { %s1255_s28 = scalar_select %p1035_p9, 1, 0 }
  0x13   : > { %s1040_s29 = scalar_select %p42_p7, %s942_s17, %s44_s24  }
  0x14   : > { %p1042_p11 = por %p173_p10, %p57_p3  ;;  %s1049_s5 = sand.u32 1, %s942_s17  }
  0x15   : > { %s702_s6 = sshll.u32 %s1049_s5, 3  ;;  %s716_s7 = sshll.u32 %s950_s19, 7 }
  0x16   : > { %s1256_s30 = scalar_select %p1042_p11, 1, 0 }
  0x17   : > { %s1056_s10 = scalar_lea.hbm %s1246_s0, %s716_s7  ;;  %s197_s11 = scalar_lea.vmem [#allocation2], %s702_s6 }
  0x18   : > { %s207_s12 = sshll.u32 %s197_s11, 4  ;;  %p1062_p0 = pnand %p741_p13, %p1025_p4  ;;  %s1058_s12 = int_to_ptr.vmem [resolvable:$true] %s207_s12 }
  0x19   : > { %s194_s14 = scalar_lea.sflag [#allocation3], %s1049_s5  ;;  %s808_s21 = scalar_lea.hbm %s1056_s10, 128 }
  0x1a   : > { %p809_p3 = scmp.ne.s32.totalorder %s1056_s10, %s808_s21  ;;  %p810_p5 = pneg %p1062_p0 }
  0x1b   : > { %s813_s25 = scalar_lea.hbm %s1246_s0, 256  ;;  %p814_p4 = scmp.lt.u32.totalorder %s1056_s10, %s1246_s0 }
  0x1c   : > { %p811_p6 = pnand %p810_p5, %p809_p3  ;;  %p815_p10 = scmp.lt.u32.totalorder %s813_s25, %s808_s21 }
  0x1d   : > { %p817_p12 = scmp.lt.u32.totalorder %s808_s21, %s1056_s10 }
  0x1e   : > { %p812_p7 = pneg %p811_p6  ;;  %p816_p13 = por %p815_p10, %p814_p4 }
  0x20   : > { %p818_p1 = por %p817_p12, %p816_p13 }
  0x22   : > { %p819_p2 = pnand %p818_p1, %p812_p7 }
  0x24   : > { %822 = shalt.err (!%p819_p2)
}
  0x25   : > { %s823_s7 = scalar_lea.vmem %s1058_s12, 128  ;;  %s956_s8 = smov [#allocation2]  }
  0x26   : > { %p824_p3 = scmp.ne.s32.totalorder %s1058_s12, %s823_s7  ;;  %s828_s9 = sshll.u32 %s956_s8, 4  ;;  %s829_s9 = int_to_ptr.vmem [resolvable:$false] %s828_s9 }
  0x27   : > { %s830_s11 = scalar_lea.vmem %s829_s9, 256  ;;  %p831_p9 = scmp.lt.s32.totalorder %s1058_s12, %s829_s9 }
  0x28   : > { %p826_p6 = pnand %p824_p3, %p810_p5  ;;  %p832_p4 = scmp.lt.s32.totalorder %s830_s11, %s823_s7 }
  0x2a   : > { %p827_p11 = pneg %p826_p6  ;;  %p833_p10 = por %p832_p4, %p831_p9 }
  0x2c   : > { %p834_p12 = pnand %p833_p10, %p827_p11 }
  0x2e   : > { %837 = shalt.err (!%p834_p12)
}
  0x2f   : > { %733 = dma.hbm_to_vmem [thread:$0]  (!%p1062_p0), %s1056_s10, 128, %s1058_s12, %s194_s14  }
  0x30   : > { %p1258_p1 = scmp.lt.s32.totalorder %s954_s20, 3  ;;  %p1259_p2 = scmp.ge.s32.totalorder %s954_s20, 1 }
  0x31   : > { %s705_s22 = sshll.u32 %s1049_s5, 1  ;;  %s717_s24 = sshll.u32 %s950_s19, 5 }
  0x32   : > { %p1098_p7 = pnand %p1259_p2, %p1258_p1  ;;  %s1107_s6 = scalar_lea.hbm %s1247_s1, %s717_s24 }
  0x33   : > { %s218_s7 = scalar_lea.vmem [#allocation5], %s705_s22  ;;  %s215_s10 = scalar_lea.sflag [#allocation6], %s1049_s5 }
  0x34   : > { %s1260_s21 = scalar_select %p1098_p7, 1, 0 }
  0x35   : > { %s228_s8 = sshll.u32 %s218_s7, 4  ;;  %s838_s12 = scalar_lea.hbm %s1107_s6, 32  ;;  %s229_s8 = int_to_ptr.vmem [resolvable:$true] %s228_s8 }
  0x36   : > { %p839_p9 = scmp.ne.s32.totalorder %s1107_s6, %s838_s12  ;;  %s843_s11 = scalar_lea.hbm %s1247_s1, 64 }
  0x37   : > { %p844_p3 = scmp.lt.u32.totalorder %s1107_s6, %s1247_s1  ;;  %p845_p6 = scmp.lt.u32.totalorder %s843_s11, %s838_s12 }
  0x38   : > { %p841_p11 = pnand %p839_p9, %p810_p5  ;;  %p847_p10 = scmp.lt.u32.totalorder %s838_s12, %s1107_s6 }
  0x39   : > { %p846_p4 = por %p845_p6, %p844_p3 }
  0x3a   : > { %p842_p13 = pneg %p841_p11 }
  0x3b   : > { %p848_p12 = por %p847_p10, %p846_p4 }
  0x3d   : > { %p849_p1 = pnand %p848_p12, %p842_p13 }
  0x3f   : > { %852 = shalt.err (!%p849_p1)
}
  0x40   : > { %s853_s5 = scalar_lea.vmem %s229_s8, 32  ;;  %s957_s22 = smov [#allocation5]  }
  0x41   : > { %p854_p2 = scmp.ne.s32.totalorder %s229_s8, %s853_s5  ;;  %s858_s26 = sshll.u32 %s957_s22, 4  ;;  %s859_s26 = int_to_ptr.vmem [resolvable:$false] %s858_s26 }
  0x42   : > { %s860_s7 = scalar_lea.vmem %s859_s26, 64  ;;  %p861_p8 = scmp.lt.s32.totalorder %s229_s8, %s859_s26 }
  0x43   : > { %p856_p9 = pnand %p854_p2, %p810_p5  ;;  %p862_p7 = scmp.lt.s32.totalorder %s860_s7, %s853_s5 }
  0x45   : > { %p857_p11 = pneg %p856_p9  ;;  %p863_p3 = por %p862_p7, %p861_p8 }
  0x47   : > { %p864_p6 = pnand %p863_p3, %p857_p11 }
  0x49   : > { %867 = shalt.err (!%p864_p6)
}
  0x4a   : > { %736 = dma.hbm_to_vmem [thread:$0]  (!%p1062_p0), %s1107_s6, 32, %s229_s8, %s215_s10  }
  0x4b   : > { %p1261_p13 = scmp.ne.s32.totalorder %s1260_s21, 0 }
  0x4c   : > { %s1132_s12 = sand.u32 (!%p1261_p13), 1, %s938_s16   ;;  %p1262_p5 = scmp.ne.s32.totalorder (!%p1261_p13), %s1254_s27, 0 }
  0x4d   : > { %261 = sbr.rel (%p1261_p13) target bundleno = 418 (0x1a2), region = 36  ;;  %s709_s14 = sshll.u32 (!%p1261_p13), %s1132_s12, 3 }
  0x4e   : > { %s264_s9 = scalar_lea.sflag (!%p1261_p13), [#allocation3], %s1132_s12  ;;  %s267_s11 = scalar_lea.vmem (!%p1261_p13), [#allocation2], %s709_s14 }
  0x54   : > { %921 = dma.done.wait (%p1262_p5), %s264_s9, 128  }
  0x55   : > { %923 = vsyncadd (%p1262_p5), %s264_s9, 4294967168  ;;  %s710_s13 = sshll.u32 %s1132_s12, 1  ;;  %s273_s21 = scalar_lea.sflag [#allocation6], %s1132_s12 }
  0x56   : > { %s1142_s6 = scalar_lea.vmem [#allocation5], %s710_s13 }
  0x57   : > { %925 = dma.done.wait (%p1262_p5), %s273_s21, 32  }
  0x58   : > { %927 = vsyncadd (%p1262_p5), %s273_s21, 4294967264  ;;  %vm347_vm0 = vcmask 1043456   ;;  %v342_v0 = vld [vmem:[%s267_s11] sm:$0xff]  ;;  %p324_p8 = scmp.lt.s32.totalorder %s946_s18, 1  ;;  %v395_v34 = vlaneseq  ;;  %v397_v38 = vld [vmem:[%s1142_s6] sm:$0x3] }
  0x59   : > { %v345_v1 = vcombine.high %v342_v0, %v342_v0  ;;  %v348_v2 = vsel %vm347_vm0, %v342_v0, -inf  ;;  %vm448_vm6 = vcmask 1040384   ;;  %s713_s9 = sshll.u32 %s946_s18, 4  ;;  %s320_s11 = scalar_lea.vmem [#allocation7], %s1132_s12  ;;  %vm548_vm9 = vcmask 16384  }
  0x5a   : > { %v349_v3 = vrot.slane %v348_v2, 4  ;;  %s1154_s27 = scalar_select %p324_p8, %s946_s18, 1  ;;  %v396_v36 = vshrl.u32 %v395_v34, 7 }
  0x5b   : > { %v355_v4 = vsel %vm347_vm0, %v345_v1, -inf  ;;  %s564_s13 = sshll.u32 %s320_s11, 4  ;;  %s551_s18 = scalar_lea.sflag [#allocation4], %s1132_s12  ;;  %s1199_s13 = int_to_ptr.vmem [resolvable:$true] %s564_s13 }
  0x5c   : > { %v350_v5 = vmax.f32 %v348_v2, %v349_v3  ;;  %v356_v6 = vrot.slane %v355_v4, 4  ;;  %s711_s8 = sshll.u32 %s1154_s27, 1  ;;  %v1158_v37 = vsub.s32 0, %v396_v36  ;;  %v1161_v39 = vsub.s32 1, %v396_v36  ;;  %s868_s10 = scalar_lea.vmem %s1199_s13, 16 }
  0x5d   : > { %s339_s25 = scalar_lea.vmem %s1249_s3, %s711_s8  ;;  %s330_s26 = scalar_lea.vmem %s1248_s2, %s711_s8 }
  0x5e   : > { %v351_v7 = vrot.slane %v350_v5, 2  ;;  %v357_v8 = vmax.f32 %v355_v4, %v356_v6  ;;  %v401_v41 = vrot.slane %v397_v38, %v1158_v37  ;;  %v405_v43 = vrot.slane %v397_v38, %v1161_v39  ;;  %v473_v44 = vld [vmem:[%s339_s25] sm:$0x3]  ;;  %s1197_s8 = scalar_lea.hbm %s1250_s4, %s713_s9  ;;  %p869_p0 = scmp.ne.s32.totalorder %s1199_s13, %s868_s10 }
  0x5f   : > { %vm474_vm2 = vcmp.eq.s32.totalorder %v473_v44, 255  ;;  %p1263_p7 = scmp.ne.s32.totalorder %s1255_s28, 0  ;;  %s958_s24 = smov [#allocation7]  }
  0x60   : > { %v352_v9 = vmax.f32 %v350_v5, %v351_v7  ;;  %v358_v10 = vrot.slane %v357_v8, 2  ;;  %vm406_vm1 = vcmp.eq.s32.totalorder %v396_v36, %v401_v41  ;;  %vm407_vm3 = vcmp.eq.s32.totalorder %v396_v36, %v405_v43  ;;  %s872_s25 = sshll.u32 %s958_s24, 4  ;;  %s873_s25 = int_to_ptr.vmem [resolvable:$false] %s872_s25 }
  0x61   : > { %v475_v51 = vsel %vm474_vm2, 0, %v473_v44  ;;  %p870_p4 = pnand %p869_p0, %p1263_p7  ;;  %s874_s5 = scalar_lea.vmem %s873_s25, 32 }
  0x62   : > { %v353_v11 = vrot.slane %v352_v9, 1  ;;  %v359_v12 = vmax.f32 %v357_v8, %v358_v10  ;;  %v479_v57 = vrot.slane %v475_v51, %v1158_v37  ;;  %v483_v58 = vrot.slane %v475_v51, %v1161_v39  ;;  %p875_p12 = scmp.lt.s32.totalorder %s1199_s13, %s873_s25  ;;  %p876_p1 = scmp.lt.s32.totalorder %s874_s5, %s868_s10 }
  0x63   : > { %p871_p10 = pneg %p870_p4 }
  0x64   : > { %v354_v13 = vmax.f32 %v352_v9, %v353_v11  ;;  %v360_v14 = vrot.slane %v359_v12, 1  ;;  %vm484_vm4 = vcmp.eq.s32.totalorder %v396_v36, %v479_v57  ;;  %vm485_vm5 = vcmp.eq.s32.totalorder %v396_v36, %v483_v58  ;;  %p877_p2 = por %p876_p1, %p875_p12 }
  0x66   : > { %v361_v15 = vmax.f32 %v359_v12, %v360_v14  ;;  %p878_p9 = pnand %p877_p2, %p871_p10 }
  0x68   : > { %v364_v16 = vcombine.low %v354_v13, %v361_v15 }
  0x6a   : > { %v366_v17 = vsub.f32 %v342_v0, %v364_v16 }
  0x6c   : > { %v367_v18 = vmul.f32 1.442695, %v366_v17 }
  0x6e   : > { %792 = vpow2.f32 %v367_v18 }
  0x78   : > { %v793_v19 = vpop.eup %792 }
  0x79   : > { %v370_v20 = vcombine.high %v793_v19, %v793_v19  ;;  %v372_v21 = vsel %vm347_vm0, %v793_v19, 0.0 }
  0x7a   : > { %v373_v22 = vrot.slane %v372_v21, 4 }
  0x7b   : > { %v379_v23 = vsel %vm347_vm0, %v370_v20, 0.0 }
  0x7c   : > { %v374_v24 = vadd.f32 %v373_v22, %v372_v21  ;;  %v380_v25 = vrot.slane %v379_v23, 4 }
  0x7e   : > { %v375_v26 = vrot.slane %v374_v24, 2  ;;  %v381_v27 = vadd.f32 %v380_v25, %v379_v23 }
  0x80   : > { %v376_v28 = vadd.f32 %v375_v26, %v374_v24  ;;  %v382_v29 = vrot.slane %v381_v27, 2  ;;  %v343_v26 = vld [vmem:[%s330_s26] sm:$0x3] }
  0x82   : > { %v377_v30 = vrot.slane %v376_v28, 1  ;;  %v383_v31 = vadd.f32 %v382_v29, %v381_v27 }
  0x84   : > { %v378_v32 = vadd.f32 %v377_v30, %v376_v28  ;;  %v384_v33 = vrot.slane %v383_v31, 1 }
  0x86   : > { %v385_v35 = vadd.f32 %v384_v33, %v383_v31  ;;  %794 = vrcp.f32 %v378_v32 }
  0x88   : > { %796 = vrcp.f32 %v385_v35  ;;  %v439_v35 = vrot.slane %v343_v26, %v1158_v37 }
  0x8a   : > { %v461_v51 = vsel %vm448_vm6, %v439_v35, 0.0 }
  0x90   : > { %v795_v40 = vpop.eup %794 }
  0x92   : > { %v797_v42 = vpop.eup %796 }
  0x93   : > { %v392_v45 = vcombine.low %v795_v40, %v797_v42  ;;  %v443_v40 = vrot.slane %v343_v26, %v1161_v39 }
  0x95   : > { %v394_v46 = vmul.f32 %v793_v19, %v392_v45  ;;  %v462_v39 = vsel %vm448_vm6, %v443_v40, 0.0 }
  0x97   : > { %v409_v47 = vcombine.high %v394_v46, %v394_v46  ;;  %v411_v48 = vsel %vm406_vm1, %v394_v46, 0.0  ;;  %v502_v49 = vmul.f32 1.442695, %v394_v46  ;;  %v486_v1 = vsel %vm484_vm4, %v394_v46, 0.0 }
  0x98   : > { %v413_v50 = vsel %vm347_vm0, %v411_v48, 0.0  ;;  %v488_v8 = vsel %vm347_vm0, %v486_v1, 0.0 }
  0x99   : > { %v412_v52 = vsel %vm407_vm3, %v409_v47, 0.0  ;;  %v414_v53 = vrot.slane %v413_v50, 4  ;;  %798 = vpow2.f32 %v502_v49  ;;  %v487_v4 = vsel %vm485_vm5, %v409_v47, 0.0 }
  0x9a   : > { %v420_v54 = vsel %vm347_vm0, %v412_v52, 0.0  ;;  %v495_v10 = vsel %vm347_vm0, %v487_v4, 0.0  ;;  %v489_v15 = vrot.slane %v488_v8, 4 }
  0x9b   : > { %v415_v55 = vadd.f32 %v414_v53, %v413_v50  ;;  %v421_v56 = vrot.slane %v420_v54, 4  ;;  %v496_v17 = vrot.slane %v495_v10, 4 }
  0x9c   : > { %v490_v21 = vadd.f32 %v489_v15, %v488_v8 }
  0x9d   : > { %v416_v59 = vrot.slane %v415_v55, 2  ;;  %v422_v60 = vadd.f32 %v421_v56, %v420_v54  ;;  %v497_v23 = vadd.f32 %v496_v17, %v495_v10 }
  0x9e   : > { %v491_v28 = vrot.slane %v490_v21, 2 }
  0x9f   : > { %v417_v61 = vadd.f32 %v416_v59, %v415_v55  ;;  %v423_v62 = vrot.slane %v422_v60, 2  ;;  %v498_v31 = vrot.slane %v497_v23, 2  ;;  %v463_v55 = vadd.f32 %v462_v39, %v461_v51 }
  0xa0   : > { %v492_v43 = vadd.f32 %v491_v28, %v490_v21 }
  0xa1   : > { %v418_v63 = vrot.slane %v417_v61, 1  ;;  %v424_v0 = vadd.f32 %v423_v62, %v422_v60  ;;  %v499_v44 = vadd.f32 %v498_v31, %v497_v23 }
  0xa2   : > { %v493_v49 = vrot.slane %v492_v43, 1 }
  0xa3   : > { %v419_v2 = vadd.f32 %v418_v63, %v417_v61  ;;  %v425_v3 = vrot.slane %v424_v0, 1  ;;  %v799_v5 = vpop.eup %798  ;;  %v500_v50 = vrot.slane %v499_v44, 1 }
  0xa4   : > { %v505_v9 = vcombine.high %v799_v5, %v799_v5  ;;  %v507_v11 = vsel %vm347_vm0, %v799_v5, 0.0  ;;  %v494_v53 = vadd.f32 %v493_v49, %v492_v43 }
  0xa5   : > { %v426_v6 = vadd.f32 %v425_v3, %v424_v0  ;;  %v427_v7 = vadd.f32 1e-07, %v419_v2  ;;  %v508_v13 = vrot.slane %v507_v11, 4  ;;  %v501_v56 = vadd.f32 %v500_v50, %v499_v44 }
  0xa6   : > { %v514_v14 = vsel %vm347_vm0, %v505_v9, 0.0 }
  0xa7   : > { %v428_v12 = vadd.f32 1e-07, %v426_v6  ;;  %800 = vlog2.f32 %v427_v7  ;;  %v515_v16 = vrot.slane %v514_v14, 4  ;;  %v509_v18 = vadd.f32 %v508_v13, %v507_v11 }
  0xa9   : > { %802 = vlog2.f32 %v428_v12  ;;  %v516_v19 = vadd.f32 %v515_v16, %v514_v14  ;;  %v510_v20 = vrot.slane %v509_v18, 2 }
  0xab   : > { %v517_v22 = vrot.slane %v516_v19, 2  ;;  %v511_v24 = vadd.f32 %v510_v20, %v509_v18 }
  0xad   : > { %v518_v25 = vadd.f32 %v517_v22, %v516_v19  ;;  %v512_v27 = vrot.slane %v511_v24, 1  ;;  %v540_v22 = vand.u32 127, %v395_v34 }
  0xaf   : > { %v519_v29 = vrot.slane %v518_v25, 1  ;;  %v513_v32 = vadd.f32 %v512_v27, %v511_v24  ;;  %vm542_vm7 = vcmp.eq.s32.totalorder %v540_v22, 1  ;;  %vm541_vm8 = vcmp.eq.s32.totalorder %v540_v22, 0 }
  0xb1   : > { %v801_v30 = vpop.eup %800  ;;  %v520_v36 = vadd.f32 %v519_v29, %v518_v25  ;;  %804 = vlog2.f32 %v513_v32 }
  0xb2   : > { %v430_v33 = vmul.f32 0.6931472, %v801_v30 }
  0xb3   : > { %v803_v38 = vpop.eup %802  ;;  %806 = vlog2.f32 %v520_v36 }
  0xb4   : > { %v432_v41 = vmul.f32 0.6931472, %v803_v38  ;;  %v433_v42 = vsub.f32 0.0, %v430_v33 }
  0xb6   : > { %v434_v45 = vsub.f32 0.0, %v432_v41  ;;  %v446_v46 = vmul.f32 %v439_v35, %v433_v42 }
  0xb8   : > { %v447_v47 = vmul.f32 %v443_v40, %v434_v45  ;;  %v449_v48 = vsel %vm448_vm6, %v446_v46, 0.0 }
  0xba   : > { %v450_v37 = vsel %vm448_vm6, %v447_v47, 0.0 }
  0xbb   : > { %v451_v52 = vadd.f32 %v450_v37, %v449_v48  ;;  %v805_v54 = vpop.eup %804 }
  0xbc   : > { %v522_v58 = vmul.f32 0.6931472, %v805_v54 }
  0xbd   : > { %452 = vadd.xlane.f32.xlu0 %v451_v52  ;;  %v807_v57 = vpop.eup %806 }
  0xbe   : > { %v524_v59 = vmul.f32 0.6931472, %v807_v57  ;;  %v525_v60 = vsub.f32 %v522_v58, %v494_v53 }
  0xc0   : > { %v526_v61 = vsub.f32 %v524_v59, %v501_v56  ;;  %v527_v62 = vsel %vm448_vm6, %v525_v60, 0.0 }
  0xc1   : > { %464 = vadd.xlane.f32.xlu0 %v463_v55 }
  0xc2   : > { %v528_v63 = vsel %vm448_vm6, %v526_v61, 0.0 }
  0xc3   : > { %v529_v0 = vadd.f32 %v528_v63, %v527_v62 }
  0xc5   : > { %530 = vadd.xlane.f32.xlu1 %v529_v0 }
 0x14a   : > { %v453_v1 = vpop.xlane.xlu0 %452 }
 0x14b   : > { %v454_v2 = vrot.slane %v453_v1, 4 }
 0x14d   : > { %v455_v3 = vadd.f32 %v454_v2, %v453_v1 }
 0x14e   : > { %v465_v4 = vpop.xlane.xlu0 %464 }
 0x14f   : > { %v456_v5 = vrot.slane %v455_v3, 2  ;;  %v466_v6 = vrot.slane %v465_v4, 4 }
 0x151   : > { %v467_v7 = vadd.f32 %v466_v6, %v465_v4  ;;  %v457_v8 = vadd.f32 %v456_v5, %v455_v3 }
 0x152   : > { %v531_v10 = vpop.xlane.xlu1 %530 }
 0x153   : > { %v468_v9 = vrot.slane %v467_v7, 2  ;;  %v458_v11 = vrot.slane %v457_v8, 1  ;;  %v532_v12 = vrot.slane %v531_v10, 4 }
 0x155   : > { %v469_v13 = vadd.f32 %v468_v9, %v467_v7  ;;  %v459_v14 = vadd.f32 %v458_v11, %v457_v8  ;;  %v533_v15 = vadd.f32 %v532_v12, %v531_v10 }
 0x157   : > { %718 = vpush %v459_v14  ;;  %v470_v16 = vrot.slane %v469_v13, 1  ;;  %v534_v17 = vrot.slane %v533_v15, 2 }
 0x159   : > { %v471_v18 = vadd.f32 %v470_v16, %v469_v13  ;;  %v535_v19 = vadd.f32 %v534_v17, %v533_v15 }
 0x15b   : > { %720 = vpush %v471_v18  ;;  %v536_v20 = vrot.slane %v535_v19, 1 }
 0x15d   : > { %v537_v21 = vadd.f32 %v536_v20, %v535_v19 }
 0x15f   : > { %722 = vpush %v537_v21 }
 0x188   : > { %s719_s7 = spop %718 }
 0x189   : > { %v546_v25 = vstv %s719_s7 }
 0x18c   : > { %s721_s14 = spop %720 }
 0x18d   : > { %v543_v23 = vstv %s721_s14 }
 0x190   : > { %s723_s21 = spop %722 }
 0x191   : > { %v544_v24 = vstv %s723_s21 }
 0x192   : > { %v545_v26 = vsel %vm542_vm7, %v543_v23, %v544_v24 }
 0x193   : > { %v547_v34 = vsel %vm541_vm8, %v546_v25, %v545_v26 }
 0x194   : > { %549 = vst.msk [vmem:[%s320_s11] sm:$0x1] %vm548_vm9, %v547_v34 }
 0x195   : > { %881 = shalt.err (!%p878_p9)
}
 0x196   : > { %s882_s12 = scalar_lea.hbm %s1197_s8, 16  ;;  %s886_s7 = scalar_lea.hbm %s1250_s4, 32 }
 0x197   : > { %p883_p11 = scmp.ne.s32.totalorder %s1197_s8, %s882_s12  ;;  %p887_p13 = scmp.lt.u32.totalorder %s1197_s8, %s1250_s4 }
 0x198   : > { %p888_p5 = scmp.lt.u32.totalorder %s886_s7, %s882_s12  ;;  %p890_p0 = scmp.lt.u32.totalorder %s882_s12, %s1197_s8 }
 0x199   : > { %p884_p3 = pnand %p883_p11, %p1263_p7 }
 0x19a   : > { %p889_p8 = por %p888_p5, %p887_p13 }
 0x19b   : > { %p885_p6 = pneg %p884_p3 }
 0x19c   : > { %p891_p4 = por %p890_p0, %p889_p8 }
 0x19e   : > { %p892_p10 = pnand %p891_p4, %p885_p6 }
 0x1a0   : > { %895 = shalt.err (!%p892_p10)
}
 0x1a1   : > { %728 = dma.vmem_to_hbm [thread:$0]  (%p1263_p7), %s1199_s13, 16, %s1197_s8, %s551_s18  }
 0x1a2 PF: > { %s576_s11 = sand.u32 1, %s934_s15   ;;  %p1264_p12 = scmp.ne.s32.totalorder %s1256_s30, 0 }
 0x1a3   : > { %p1265_p1 = scmp.ge.s32.totalorder %s954_s20, 2  ;;  %s577_s21 = scalar_lea.sflag [#allocation4], %s576_s11 }
 0x1a5   : > { %p738_p2 = pnand %p1265_p1, %p1264_p12 }
 0x1a7   : > { %929 = dma.done.wait (!%p738_p2), %s577_s21, 16  }
 0x1a8   : > { %931 = vsyncadd (!%p738_p2), %s577_s21, 4294967280  ;;  %s23_s20 = sadd.s32 1, %s954_s20   ;;  %s1266_s15 = smov %s938_s16 }
 0x1a9   : > { %p20_p9 = scmp.ge.s32.totalorder %s23_s20, 4   ;;  %s1267_s16 = smov %s942_s17 }
 0x1aa   : > { %s1268_s17 = smov %s1040_s29  ;;  %s1269_s18 = smov %s950_s19 }
 0x1ab   : > { %s1270_s19 = smov %s1272_s23  ;;  %22 = sbr.rel (!%p20_p9) target bundleno = 8 (0x8), region = 100 }
 0x1b2   :  { %581 = vsyncpa [#allocation3], 1 }
 0x1b3   :  { %583 = vsyncpa [#allocation3 + $0x1], 1 }
 0x1b4   :  { %584 = vsyncpa [#allocation6], 1 }
 0x1b5   :  { %586 = vsyncpa [#allocation6 + $0x1], 1 }
 0x1b6   :  { %587 = vsyncpa [#allocation4], 1 }
 0x1b7   :  { %589 = vsyncpa [#allocation4 + $0x1], 1 }

</bundles_post_ra>
